<compile_context>
chip_gen: v6e
topology: v6e:2x2x1
jax: 0.10.0
libtpu: 0.0.40
codegen_flags: <defaults>
</compile_context>

<pallas_src>
import jax
import jax.numpy as jnp
from jax.experimental import pallas as pl
from jax.experimental.pallas import tpu as pltpu


# ----------------------------------------------------------------------------
# Kernel: activations are (features, batch) -> batch on the lane axis, so the
# tanh (EUP), bias add (VPU) and output store (unmasked vst) are lane-dense.
# ----------------------------------------------------------------------------
def _mlp_kernel(x_ref, w1_ref, wh_ref, bh_ref, w6_ref, b6_ref, o_ref):
    # x_ref : (4, B_tile)      input tile, batch on lanes
    # w1_ref: (16, 4)          folded layer-1 weight (0.5*W1)
    # wh_ref: (4, 16, 16)      folded hidden weights (0.25*W_k), layers 2..5
    # bh_ref: (5, 16, 1)       folded biases for layers 1..5
    # w6_ref: (1, 16)          folded output weight (0.5*W6)
    # b6_ref: (1, 1)           folded output bias
    # o_ref : (1, B_tile)
    x = x_ref[...]

    # t_k = tanh(W_k' t_{k-1} + b_k')  — sigmoid affine terms pre-folded.
    t = jnp.tanh(
        jnp.dot(w1_ref[...], x, preferred_element_type=jnp.float32) + bh_ref[0]
    )
    for i in range(4):  # layers 2..5, static unroll (shapes are tiny)
        t = jnp.tanh(
            jnp.dot(wh_ref[i], t, preferred_element_type=jnp.float32)
            + bh_ref[i + 1]
        )
    out = jnp.dot(w6_ref[...], t, preferred_element_type=jnp.float32) + b6_ref[...]
    o_ref[...] = jnp.maximum(out, 0.0)  # relu


# ----------------------------------------------------------------------------
# Param folding:  sigmoid(z) = 0.5*(1 + tanh(0.5*z))
#   layer 1:  W1' = 0.5*W1,            b1' = 0.5*b1
#   layer k:  Wk' = 0.25*Wk,           bk' = 0.25*rowsum(Wk) + 0.5*bk   (k=2..5)
#   layer 6:  W6' = 0.5*W6,            b6' = 0.5*rowsum(W6) + b6
# so that the kernel computes t = tanh(W'·t + b') per hidden layer and
# relu(W6'·t + b6') at the end — exactly the original forward pass.
# ----------------------------------------------------------------------------
def fold_params(params):
    w1, wh, bh, w6, b6 = params
    w1p = 0.5 * w1                                                    # (16, 4)
    b1p = 0.5 * bh[0]                                                 # (16, 1)
    whp = 0.25 * wh                                                   # (4, 16, 16)
    bhp_rest = 0.25 * jnp.sum(wh, axis=2, keepdims=True) + 0.5 * bh[1:]
    bhp = jnp.concatenate([b1p[None], bhp_rest], axis=0)              # (5, 16, 1)
    w6p = 0.5 * w6                                                    # (1, 16)
    b6p = 0.5 * jnp.sum(w6, axis=1, keepdims=True) + b6               # (1, 1)
    return (w1p, whp, bhp, w6p, b6p)


def _pick_tile(B, *, max_tile=2048, min_grid=2):
    """Lane-dense batch tile: multiple of 128, capped at max_tile, and small
    enough that the grid keeps >= min_grid tiles (v7x has 2 TensorCores)."""
    per_core = -(-B // min_grid)            # ceil(B / min_grid)
    tile = -(-per_core // 128) * 128        # round up to a lane multiple
    return max(128, min(max_tile, tile))


def net_forward(x, params, *, max_tile=2048):
    """x: (B, 4) float32 (PyTorch Linear convention). Returns (B, 1) float32."""
    w1p, whp, bhp, w6p, b6p = fold_params(params)

    B = x.shape[0]
    b_tile = _pick_tile(B, max_tile=max_tile)
    n_tiles = pl.cdiv(B, b_tile)
    Bp = n_tiles * b_tile

    # Layout plumbing: transpose to (features, batch) and pad batch to a tile
    # multiple.  jnp.pad(x.T, ...) fuses into a single pad op (no zeros+scatter
    # round trip); when Bp == B it is a no-op.
    xt = x.T
    if Bp != B:
        xt = jnp.pad(xt, ((0, 0), (0, Bp - B)))

    out_t = pl.pallas_call(
        _mlp_kernel,
        out_shape=jax.ShapeDtypeStruct((1, Bp), jnp.float32),
        grid_spec=pltpu.PrefetchScalarGridSpec(
            num_scalar_prefetch=0,
            grid=(n_tiles,),
            in_specs=[
                pl.BlockSpec((4, b_tile), lambda i: (0, i)),      # x tile
                pl.BlockSpec((16, 4), lambda i: (0, 0)),          # w1' (resident)
                pl.BlockSpec((4, 16, 16), lambda i: (0, 0, 0)),   # packed hidden W'
                pl.BlockSpec((5, 16, 1), lambda i: (0, 0, 0)),    # packed biases'
                pl.BlockSpec((1, 16), lambda i: (0, 0)),          # w6'
                pl.BlockSpec((1, 1), lambda i: (0, 0)),           # b6'
            ],
            out_specs=pl.BlockSpec((1, b_tile), lambda i: (0, i)),
        ),
        compiler_params=pltpu.CompilerParams(
            dimension_semantics=("parallel",),
        ),
    )(xt, w1p, whp, bhp, w6p, b6p)

    return out_t[:, :B].T  # (B, 1)


def init_params(key):
    """Deterministic init mimicking PyTorch Linear default:
    U(-1/sqrt(fan_in), 1/sqrt(fan_in)) for weight and bias.
    Weights are stored torch-style (out_features, in_features)."""
    def uinit(k, shape, fan_in):
        bound = 1.0 / (fan_in ** 0.5)
        return jax.random.uniform(k, shape, jnp.float32, -bound, bound)

    keys = jax.random.split(key, 12)
    w1 = uinit(keys[0], (16, 4), 4)
    b1 = uinit(keys[1], (16, 1), 4)
    wh = jnp.stack([uinit(keys[2 + i], (16, 16), 16) for i in range(4)])        # (4,16,16)
    bh = jnp.stack([b1] + [uinit(keys[6 + i], (16, 1), 16) for i in range(4)])  # (5,16,1)
    w6 = uinit(keys[10], (1, 16), 16)
    b6 = uinit(keys[11], (1, 1), 16)
    return (w1, wh, bh, w6, b6)


def reference_forward(x, params):
    """Pure-JAX reference matching the PyTorch module semantics (unfolded)."""
    w1, wh, bh, w6, b6 = params
    h = jax.nn.sigmoid(x @ w1.T + bh[0].T)
    for i in range(4):
        h = jax.nn.sigmoid(h @ wh[i].T + bh[i + 1].T)
    return jnp.maximum(h @ w6.T + b6.T, 0.0)


if __name__ == "__main__":
    key = jax.random.PRNGKey(0)
    key, kx1, kx2 = jax.random.split(key, 3)
    params = init_params(key)

    # Moderate batch: tile picker gives b_tile=256, grid of 2 "parallel" tiles.
    B = 512
    x = jax.random.normal(kx1, (B, 4), jnp.float32)
    out = jax.block_until_ready(net_forward(x, params))
    ref = reference_forward(x, params)
    assert out.shape == (B, 1)
    assert jnp.allclose(out, ref, atol=1e-4, rtol=1e-4)

    # Tiny batch (non-multiple of 128) exercising the padding path.
    x_small = jax.random.normal(kx2, (8, 4), jnp.float32)
    out_small = jax.block_until_ready(net_forward(x_small, params))
    ref_small = reference_forward(x_small, params)
    assert out_small.shape == (8, 1)
    assert jnp.allclose(out_small, ref_small, atol=1e-4, rtol=1e-4)

    print("KERNEL_OK")
</pallas_src>

<mosaic_0001>
module attributes {stable_mosaic.version = 11 : i64} {
  func.func @_mlp_kernel(%arg0: i32, %arg1: memref<4x256xf32, #tpu.memory_space<vmem>>, %arg2: memref<16x4xf32, #tpu.memory_space<vmem>>, %arg3: memref<4x16x16xf32, #tpu.memory_space<vmem>>, %arg4: memref<5x16x1xf32, #tpu.memory_space<vmem>>, %arg5: memref<1x16xf32, #tpu.memory_space<vmem>>, %arg6: memref<1x1xf32, #tpu.memory_space<vmem>>, %arg7: memref<1x256xf32, #tpu.memory_space<vmem>>) attributes {dimension_semantics = [#tpu.dimension_semantics<parallel>], iteration_bounds = array<i64: 2>, scalar_prefetch = 0 : i64, scratch_operands = 0 : i64, tpu.core_type = #tpu.core_type<tc>, window_params = [{transform_indices = @transform_0, window_bounds = array<i64: 4, 256>}, {pipeline_mode = #tpu.pipeline_mode<synchronous>, transform_indices = @transform_1, window_bounds = array<i64: 16, 4>}, {pipeline_mode = #tpu.pipeline_mode<synchronous>, transform_indices = @transform_2, window_bounds = array<i64: 4, 16, 16>}, {pipeline_mode = #tpu.pipeline_mode<synchronous>, transform_indices = @transform_3, window_bounds = array<i64: 5, 16, 1>}, {pipeline_mode = #tpu.pipeline_mode<synchronous>, transform_indices = @transform_4, window_bounds = array<i64: 1, 16>}, {pipeline_mode = #tpu.pipeline_mode<synchronous>, transform_indices = @transform_5, window_bounds = array<i64: 1, 1>}, {transform_indices = @transform_6, window_bounds = array<i64: 1, 256>}]} {
    %c0 = arith.constant 0 : index
    %c0_0 = arith.constant 0 : index
    %0 = vector.load %arg1[%c0, %c0_0] : memref<4x256xf32, #tpu.memory_space<vmem>>, vector<4x256xf32>
    %c0_1 = arith.constant 0 : index
    %c0_2 = arith.constant 0 : index
    %1 = vector.load %arg2[%c0_1, %c0_2] : memref<16x4xf32, #tpu.memory_space<vmem>>, vector<16x4xf32>
    %cst = arith.constant dense<0.000000e+00> : vector<16x256xf32>
    %2 = tpu.matmul %1, %0, %cst {dimension_numbers = #tpu.dot_dimension_numbers<[1], [0], [0], [1], [0, 0, 1, 1], [], []>} : vector<16x4xf32>, vector<4x256xf32>, vector<16x256xf32> -> vector<16x256xf32>
    %c0_3 = arith.constant 0 : index
    %c0_4 = arith.constant 0 : index
    %c0_5 = arith.constant 0 : index
    %3 = vector.load %arg4[%c0_3, %c0_4, %c0_5] : memref<5x16x1xf32, #tpu.memory_space<vmem>>, vector<1x16x1xf32>
    %4 = vector.shape_cast %3 : vector<1x16x1xf32> to vector<16x1xf32>
    %5 = vector.broadcast %4 : vector<16x1xf32> to vector<16x256xf32>
    %6 = arith.addf %2, %5 : vector<16x256xf32>
    %7 = math.tanh %6 : vector<16x256xf32>
    %c0_6 = arith.constant 0 : index
    %c0_7 = arith.constant 0 : index
    %c0_8 = arith.constant 0 : index
    %8 = vector.load %arg3[%c0_6, %c0_7, %c0_8] : memref<4x16x16xf32, #tpu.memory_space<vmem>>, vector<1x16x16xf32>
    %9 = vector.shape_cast %8 : vector<1x16x16xf32> to vector<16x16xf32>
    %cst_9 = arith.constant dense<0.000000e+00> : vector<16x256xf32>
    %10 = tpu.matmul %9, %7, %cst_9 {dimension_numbers = #tpu.dot_dimension_numbers<[1], [0], [0], [1], [0, 0, 1, 1], [], []>} : vector<16x16xf32>, vector<16x256xf32>, vector<16x256xf32> -> vector<16x256xf32>
    %c1 = arith.constant 1 : index
    %c0_10 = arith.constant 0 : index
    %c0_11 = arith.constant 0 : index
    %11 = vector.load %arg4[%c1, %c0_10, %c0_11] : memref<5x16x1xf32, #tpu.memory_space<vmem>>, vector<1x16x1xf32>
    %12 = vector.shape_cast %11 : vector<1x16x1xf32> to vector<16x1xf32>
    %13 = vector.broadcast %12 : vector<16x1xf32> to vector<16x256xf32>
    %14 = arith.addf %10, %13 : vector<16x256xf32>
    %15 = math.tanh %14 : vector<16x256xf32>
    %c1_12 = arith.constant 1 : index
    %c0_13 = arith.constant 0 : index
    %c0_14 = arith.constant 0 : index
    %16 = vector.load %arg3[%c1_12, %c0_13, %c0_14] : memref<4x16x16xf32, #tpu.memory_space<vmem>>, vector<1x16x16xf32>
    %17 = vector.shape_cast %16 : vector<1x16x16xf32> to vector<16x16xf32>
    %cst_15 = arith.constant dense<0.000000e+00> : vector<16x256xf32>
    %18 = tpu.matmul %17, %15, %cst_15 {dimension_numbers = #tpu.dot_dimension_numbers<[1], [0], [0], [1], [0, 0, 1, 1], [], []>} : vector<16x16xf32>, vector<16x256xf32>, vector<16x256xf32> -> vector<16x256xf32>
    %c2 = arith.constant 2 : index
    %c0_16 = arith.constant 0 : index
    %c0_17 = arith.constant 0 : index
    %19 = vector.load %arg4[%c2, %c0_16, %c0_17] : memref<5x16x1xf32, #tpu.memory_space<vmem>>, vector<1x16x1xf32>
    %20 = vector.shape_cast %19 : vector<1x16x1xf32> to vector<16x1xf32>
    %21 = vector.broadcast %20 : vector<16x1xf32> to vector<16x256xf32>
    %22 = arith.addf %18, %21 : vector<16x256xf32>
    %23 = math.tanh %22 : vector<16x256xf32>
    %c2_18 = arith.constant 2 : index
    %c0_19 = arith.constant 0 : index
    %c0_20 = arith.constant 0 : index
    %24 = vector.load %arg3[%c2_18, %c0_19, %c0_20] : memref<4x16x16xf32, #tpu.memory_space<vmem>>, vector<1x16x16xf32>
    %25 = vector.shape_cast %24 : vector<1x16x16xf32> to vector<16x16xf32>
    %cst_21 = arith.constant dense<0.000000e+00> : vector<16x256xf32>
    %26 = tpu.matmul %25, %23, %cst_21 {dimension_numbers = #tpu.dot_dimension_numbers<[1], [0], [0], [1], [0, 0, 1, 1], [], []>} : vector<16x16xf32>, vector<16x256xf32>, vector<16x256xf32> -> vector<16x256xf32>
    %c3 = arith.constant 3 : index
    %c0_22 = arith.constant 0 : index
    %c0_23 = arith.constant 0 : index
    %27 = vector.load %arg4[%c3, %c0_22, %c0_23] : memref<5x16x1xf32, #tpu.memory_space<vmem>>, vector<1x16x1xf32>
    %28 = vector.shape_cast %27 : vector<1x16x1xf32> to vector<16x1xf32>
    %29 = vector.broadcast %28 : vector<16x1xf32> to vector<16x256xf32>
    %30 = arith.addf %26, %29 : vector<16x256xf32>
    %31 = math.tanh %30 : vector<16x256xf32>
    %c3_24 = arith.constant 3 : index
    %c0_25 = arith.constant 0 : index
    %c0_26 = arith.constant 0 : index
    %32 = vector.load %arg3[%c3_24, %c0_25, %c0_26] : memref<4x16x16xf32, #tpu.memory_space<vmem>>, vector<1x16x16xf32>
    %33 = vector.shape_cast %32 : vector<1x16x16xf32> to vector<16x16xf32>
    %cst_27 = arith.constant dense<0.000000e+00> : vector<16x256xf32>
    %34 = tpu.matmul %33, %31, %cst_27 {dimension_numbers = #tpu.dot_dimension_numbers<[1], [0], [0], [1], [0, 0, 1, 1], [], []>} : vector<16x16xf32>, vector<16x256xf32>, vector<16x256xf32> -> vector<16x256xf32>
    %c4 = arith.constant 4 : index
    %c0_28 = arith.constant 0 : index
    %c0_29 = arith.constant 0 : index
    %35 = vector.load %arg4[%c4, %c0_28, %c0_29] : memref<5x16x1xf32, #tpu.memory_space<vmem>>, vector<1x16x1xf32>
    %36 = vector.shape_cast %35 : vector<1x16x1xf32> to vector<16x1xf32>
    %37 = vector.broadcast %36 : vector<16x1xf32> to vector<16x256xf32>
    %38 = arith.addf %34, %37 : vector<16x256xf32>
    %39 = math.tanh %38 : vector<16x256xf32>
    %c0_30 = arith.constant 0 : index
    %c0_31 = arith.constant 0 : index
    %40 = vector.load %arg5[%c0_30, %c0_31] : memref<1x16xf32, #tpu.memory_space<vmem>>, vector<1x16xf32>
    %cst_32 = arith.constant dense<0.000000e+00> : vector<1x256xf32>
    %41 = tpu.matmul %40, %39, %cst_32 {dimension_numbers = #tpu.dot_dimension_numbers<[1], [0], [0], [1], [0, 0, 1, 1], [], []>} : vector<1x16xf32>, vector<16x256xf32>, vector<1x256xf32> -> vector<1x256xf32>
    %c0_33 = arith.constant 0 : index
    %c0_34 = arith.constant 0 : index
    %42 = vector.load %arg6[%c0_33, %c0_34] : memref<1x1xf32, #tpu.memory_space<vmem>>, vector<1x1xf32>
    %43 = vector.broadcast %42 : vector<1x1xf32> to vector<1x256xf32>
    %44 = arith.addf %41, %43 : vector<1x256xf32>
    %cst_35 = arith.constant 0.000000e+00 : f32
    %45 = vector.broadcast %cst_35 : f32 to vector<1x256xf32>
    %46 = arith.maximumf %44, %45 : vector<1x256xf32>
    %c0_36 = arith.constant 0 : index
    %c0_37 = arith.constant 0 : index
    %47 = vector.load %arg7[%c0_36, %c0_37] : memref<1x256xf32, #tpu.memory_space<vmem>>, vector<1x256xf32>
    tpu.vector_store %arg7[%c0_36, %c0_37], %46 {strides = array<i32>} : memref<1x256xf32, #tpu.memory_space<vmem>>, vector<1x256xf32>,
    return
  }
  func.func @transform_0(%arg0: i32) -> (i32, i32) {
    %c0_i32 = arith.constant 0 : i32
    %c0_i32_0 = arith.constant 0 : i32
    return %c0_i32, %arg0 : i32, i32
  }
  func.func @transform_1(%arg0: i32) -> (i32, i32) {
    %c0_i32 = arith.constant 0 : i32
    %c0_i32_0 = arith.constant 0 : i32
    %c0_i32_1 = arith.constant 0 : i32
    return %c0_i32, %c0_i32_0 : i32, i32
  }
  func.func @transform_2(%arg0: i32) -> (i32, i32, i32) {
    %c0_i32 = arith.constant 0 : i32
    %c0_i32_0 = arith.constant 0 : i32
    %c0_i32_1 = arith.constant 0 : i32
    %c0_i32_2 = arith.constant 0 : i32
    return %c0_i32, %c0_i32_0, %c0_i32_1 : i32, i32, i32
  }
  func.func @transform_3(%arg0: i32) -> (i32, i32, i32) {
    %c0_i32 = arith.constant 0 : i32
    %c0_i32_0 = arith.constant 0 : i32
    %c0_i32_1 = arith.constant 0 : i32
    %c0_i32_2 = arith.constant 0 : i32
    return %c0_i32, %c0_i32_0, %c0_i32_1 : i32, i32, i32
  }
  func.func @transform_4(%arg0: i32) -> (i32, i32) {
    %c0_i32 = arith.constant 0 : i32
    %c0_i32_0 = arith.constant 0 : i32
    %c0_i32_1 = arith.constant 0 : i32
    return %c0_i32, %c0_i32_0 : i32, i32
  }
  func.func @transform_5(%arg0: i32) -> (i32, i32) {
    %c0_i32 = arith.constant 0 : i32
    %c0_i32_0 = arith.constant 0 : i32
    %c0_i32_1 = arith.constant 0 : i32
    return %c0_i32, %c0_i32_0 : i32, i32
  }
  func.func @transform_6(%arg0: i32) -> (i32, i32) {
    %c0_i32 = arith.constant 0 : i32
    %c0_i32_0 = arith.constant 0 : i32
    return %c0_i32, %arg0 : i32, i32
  }
}

</mosaic_0001>

<bundles_post_ra>
// kernel: tpu_custom_call.1
= control target key start
LH: loop header
LB: loop body
LE: loop exit
PB: predicated region body
PF: predicated region fallthrough
CT: control target
= control target key end

     0   :  { %s1359_s0 = inlined_call_operand.vmem [shape: f32[4,512], index: 0, kind: input, shape index: {}]   ;;  %s1360_s1 = inlined_call_operand.vmem [shape: f32[16,4], index: 1, kind: input, shape index: {}]   ;;  %s1361_s2 = inlined_call_operand.vmem [shape: f32[4,16,16], index: 2, kind: input, shape index: {}]   ;;  %s1362_s3 = inlined_call_operand.vmem [shape: f32[5,16,1], index: 3, kind: input, shape index: {}]   ;;  %s1363_s4 = inlined_call_operand.vmem [shape: f32[1,16], index: 4, kind: input, shape index: {}]   ;;  %s1364_s5 = inlined_call_operand.<no memory space> [shape: f32[1,1], index: 5, kind: input, shape index: {}]   ;;  %s1365_s6 = inlined_call_operand.hbm [shape: f32[1,512], index: 6, kind: output, shape index: {}]  }
   0x1   :  { %v11_v0 = vstv %s1364_s5 }
   0x2   :  { %12 = vst [vmem:[#allocation2] sm:$0x1] %v11_v0 }
   0x3   :  { %13 = vsyncpa [#allocation4], 0 }
   0x4   :  { %15 = vsyncpa [#allocation4 + $0x1], 0  ;;  %s1190_s23 = smov 0   ;;  %s1192_s24 = smov 0  }
   0x5   :  { %s1194_s25 = smov 0   ;;  %s1196_s26 = smov 0  }
   0x6 LB: > { %s1211_s5 = sadd.s32 4294967295, %s1146_s26   ;;  %s961_s27 = sadd.s32 4294967294, %s1146_s26   ;;  %s1146_s26 = sphi %s1196_s26, %s1371_s26   ;;  %s1142_s25 = sphi %s1194_s25, %s1370_s25   ;;  %s1138_s24 = sphi %s1192_s24, %s1369_s24   ;;  %s1134_s23 = sphi %s1190_s23, %s1368_s23  }
   0x7   : > { %s1215_s28 = sadd.s32 1, %s1146_s26   ;;  %s159_s29 = sadd.s32 1, %s1142_s25 }
   0x8   : > { %s156_s30 = ssub.s32 %s1146_s26, %s1215_s28  ;;  %p169_p0 = scmp.ne.s32.totalorder %s1142_s25, %s1138_s24 }
   0x9   : > { %p157_p1 = scmp.eq.s32.totalorder %s156_s30, 0  ;;  %p170_p2 = scmp.eq.s32.totalorder %s1211_s5, 1 }
   0xa   : > { %p175_p3 = scmp.ne.s32.totalorder %s1138_s24, %s1134_s23  ;;  %p176_p4 = scmp.eq.s32.totalorder %s961_s27, 1 }
   0xb   : > { %s1226_s7 = scalar_select %p157_p1, %s1142_s25, %s159_s29  }
   0xc   : > { %p1228_p5 = por %p170_p2, %p169_p0  ;;  %p1232_p6 = por %p176_p4, %p175_p3 }
   0xd   : > { %p964_p7 = scmp.ge.s32.totalorder %s1146_s26, 1  ;;  %p218_p8 = scmp.lt.s32.totalorder %s1146_s26, 3 }
   0xf   : > { %p219_p9 = pnand %p964_p7, %p218_p8 }
  0x10   : > { %s966_s10 = sshll.u32 (!%p219_p9), %s1211_s5, 1  ;;  %s245_s30 = sand.u32 (!%p219_p9), 1, %s1138_s24  }
  0x11   : > { %222 = sbr.rel (%p219_p9) target bundleno = 1343 (0x53f), region = 44  ;;  %p249_p10 = scmp.lt.s32.totalorder (!%p219_p9), %s966_s10, 3 }
  0x12   : > { %s1000_s11 = sshll.u32 (!%p219_p9), %s1211_s5, 5  ;;  %s888_s17 = scalar_lea.sflag (!%p219_p9), [#allocation4], %s245_s30 }
  0x13   : > { %s900_s16 = scalar_lea.hbm (!%p219_p9), %s1365_s6, %s1000_s11  ;;  %s1151_s19 = smov (!%p219_p9), [#allocation3]  }
  0x14   : > { %s1090_s20 = sshll.u32 (!%p219_p9), %s1151_s19, 4  ;;  %s1091_s20 = int_to_ptr.vmem [resolvable:$false] %s1090_s20 }
  0x15   : > { %s1092_s5 = scalar_lea.vmem (!%p219_p9), %s1091_s20, 64 }
  0x16   : > { %v1148_v1 = vmov 0.0   ;;  %v259_v2 = vld [vmem:[%s1362_s3 + $0x8] sm:$0xff]  ;;  %v1149_v3 = vmov 0   ;;  %s1373_s10 = smov (!%p249_p10, %s966_s10), 3  ;;  %v258_v4 = vld [vmem:[%s1362_s3] sm:$0xff]  ;;  %vm279_vm0 = vcmask 1043456  }
  0x17   : > { %348 = vmatprep.mubr.f32.mxu0 %v1148_v1  ;;  %451 = vmatprep.mubr.f32.mxu1 %v1148_v1  ;;  %s967_s15 = sshll.u32 %s1373_s10, 2  ;;  %v979_v7 = vld [vmem:[%s1362_s3 + $0x28] sm:$0xff]  ;;  %v256_v8 = vld [vmem:[%s1360_s1] sm:$0xff]  ;;  %vm272_vm1 = vcmask 31744   ;;  %v985_v9 = vld [vmem:[%s1362_s3 + $0x38] sm:$0xff]  ;;  %vm380_vm2 = vcmask 130048  }
  0x18   : > { %1043 = vset.pattern.permute.xlu0 %v1149_v3  ;;  %1044 = vset.pattern.permute.xlu1 %v1149_v3  ;;  %s252_s18 = scalar_lea.vmem %s1359_s0, %s967_s15  ;;  %v257_v10 = vld [vmem:[%s1360_s1 + $0x8] sm:$0xff]  ;;  %v778_v12 = vld [vmem:[#allocation2] sm:$0x1]  ;;  %v973_v13 = vld [vmem:[%s1362_s3 + $0x18] sm:$0xff]  ;;  %s965_s10 = sshll.u32 %s245_s30, 1 }
  0x19   : > { %267 = vperm.xlu0 %1043, %v259_v2   ;;  %v255_v5 = vld [vmem:[%s252_s18] sm:$0xff]  ;;  %v991_v11 = vld [vmem:[%s1362_s3 + $0x48] sm:$0xff]  ;;  %377 = vperm.xlu1 %1044, %v973_v13   ;;  %v972_v14 = vld [vmem:[%s1362_s3 + $0x10] sm:$0xff]  ;;  %s247_s12 = scalar_lea.vmem [#allocation3], %s965_s10 }
  0x1a   : > { %v271_v6 = vcombine.high %v255_v5, %v255_v5  ;;  %v978_v15 = vld [vmem:[%s1362_s3 + $0x20] sm:$0xff]  ;;  %v984_v16 = vld [vmem:[%s1362_s3 + $0x30] sm:$0xff]  ;;  %v366_v33 = vld [vmem:[%s1361_s2 + $0x8] sm:$0xff]  ;;  %s902_s13 = sshll.u32 %s247_s12, 4  ;;  %s903_s13 = int_to_ptr.vmem [resolvable:$true] %s902_s13 }
  0x1b   : > { %v990_v17 = vld [vmem:[%s1362_s3 + $0x40] sm:$0xff]  ;;  %v976_v47 = vld [vmem:[%s1361_s2 + $0x10] sm:$0xff]  ;;  %v977_v49 = vld [vmem:[%s1361_s2 + $0x18] sm:$0xff]  ;;  %s1086_s18 = scalar_lea.vmem %s903_s13, 32  ;;  %p1093_p0 = scmp.lt.s32.totalorder %s903_s13, %s1091_s20 }
  0x1c   : > { %968 = vmatprep.subr.msk.mxu0 %vm279_vm0, %v271_v6  ;;  %v365_v31 = vld [vmem:[%s1361_s2] sm:$0xff]  ;;  %v983_v2 = vld [vmem:[%s1361_s2 + $0x28] sm:$0xff]  ;;  %p1087_p11 = scmp.ne.s32.totalorder %s903_s13, %s1086_s18  ;;  %p1094_p1 = scmp.lt.s32.totalorder %s1092_s5, %s1086_s18 }
  0x1d   : > { %262 = vperm.xlu0 %1043, %v258_v4   ;;  %969 = vmatpush1.msk.msra.mxu0 %vm279_vm0, %v255_v5  ;;  %v982_v63 = vld [vmem:[%s1361_s2 + $0x20] sm:$0xff] }
  0x1e   : > { %970 = vmatmul.mubr.msk.f32.vlgmr.msra.gmra.mxu0 %vm272_vm1, %v256_v8  ;;  %372 = vperm.xlu1 %1044, %v972_v14   ;;  %p1088_p12 = pnand %p1087_p11, %p1228_p5  ;;  %p1095_p2 = por %p1094_p1, %p1093_p0 }
  0x1f   : > { %354 = vmatprep.mubr.f32.mxu0 %v1148_v1 }
  0x20   : > { %p1089_p13 = pneg %p1088_p12 }
  0x21   : > { %481 = vperm.xlu0 %1043, %v979_v7  }
  0x22   : > { %971 = vmatmul.mubr.msk.f32.gmra.mxu0 %vm272_vm1, %v257_v10  ;;  %476 = vperm.xlu1 %1044, %v978_v15   ;;  %p1096_p3 = pnand %p1095_p2, %p1089_p13 }
  0x23   : > { %554 = vmatprep.mubr.f32.mxu0 %v1148_v1 }
  0x25   : > { %584 = vperm.xlu0 %1043, %v985_v9  }
  0x26   : > { %579 = vperm.xlu1 %1044, %v984_v16   ;;  %v988_v16 = vld [vmem:[%s1361_s2 + $0x30] sm:$0xff] }
  0x29   : > { %687 = vperm.xlu0 %1043, %v991_v11  }
  0x2a   : > { %682 = vperm.xlu1 %1044, %v990_v17  }
  0x2d   : > { %781 = vperm.xlu0 %1043, %v778_v12  }
  0x94   : > { %v268_v18 = vpop.permute.xlu0 %267  ;;  %v378_v34 = vpop.permute.xlu1 %377 }
  0x98   : > { %v263_v22 = vpop.permute.xlu0 %262 }
  0x99   : > { %v373_v38 = vpop.permute.xlu1 %372 }
  0x9c   : > { %v482_v53 = vpop.permute.xlu0 %481 }
  0x9d   : > { %v477_v54 = vpop.permute.xlu1 %476 }
  0xa0   : > { %v585_v6 = vpop.permute.xlu0 %584 }
  0xa1   : > { %v580_v7 = vpop.permute.xlu1 %579 }
  0xde   : > { %v350_v19 = vpop.f32.mrf.mxu0 }
  0xdf   : > { %v351_v27 = vadd.f32 %v350_v19, %v263_v22 }
  0xe0   : > { %v352_v20 = vpop.f32.mrf.mxu0 }
  0xe1   : > { %v353_v25 = vadd.f32 %v352_v20, %v263_v22  ;;  %v688_v22 = vpop.permute.xlu0 %687 }
  0xe2   : > { %v356_v21 = vpop.f32.mrf.mxu0 }
  0xe3   : > { %v357_v23 = vadd.f32 %v356_v21, %v268_v18 }
  0xe4   : > { %v358_v24 = vpop.f32.mrf.mxu0 }
  0xe5   : > { %v359_v26 = vadd.f32 %v358_v24, %v268_v18  ;;  %v989_v18 = vld [vmem:[%s1361_s2 + $0x38] sm:$0xff] }
  0xe7   : > { %1046 = vtanh.f32 %v359_v26 }
  0xe8   : > { %1048 = vtanh.f32 %v357_v23  ;;  %v683_v23 = vpop.permute.xlu1 %682 }
  0xe9   : > { %1050 = vtanh.f32 %v353_v25 }
  0xea   : > { %1052 = vtanh.f32 %v351_v27 }
  0xf4   : > { %v1047_v28 = vpop.eup %1046 }
  0xf5   : > { %v1049_v29 = vpop.eup %1048  ;;  %415 = vmatprep.subr.mxu1 %v1047_v28 }
  0xf6   : > { %v1051_v30 = vpop.eup %1050  ;;  %416 = vmatpush1.msra.mxu1 %v1049_v29 }
  0xf7   : > { %v1053_v32 = vpop.eup %1052  ;;  %417 = vmatprep.subr.mxu1 %v1051_v30 }
  0xf8   : > { %418 = vmatpush1.msra.mxu1 %v1053_v32 }
  0xf9   : > { %974 = vmatmul.mubr.msk.f32.vlgmr.msra.gmra.mxu1 %vm380_vm2, %v365_v31  ;;  %v777_v31 = vld [vmem:[%s1363_s4] sm:$0x1] }
  0xfa   : > { %457 = vmatprep.mubr.f32.mxu1 %v1148_v1 }
  0xfd   : > { %975 = vmatmul.mubr.msk.f32.gmra.mxu1 %vm380_vm2, %v366_v33  ;;  %v784_v33 = vlaneseq }
  0xfe   : > { %657 = vmatprep.mubr.f32.mxu1 %v1148_v1 }
  0xff   : > { %vm884_vm3 = vcmp.lt.s32.totalorder %v784_v33, 256 }
 0x1b9   : > { %v453_v35 = vpop.f32.mrf.mxu1 }
 0x1ba   : > { %v454_v43 = vadd.f32 %v453_v35, %v373_v38 }
 0x1bb   : > { %v455_v36 = vpop.f32.mrf.mxu1 }
 0x1bc   : > { %v456_v41 = vadd.f32 %v455_v36, %v373_v38  ;;  %v782_v36 = vpop.permute.xlu0 %781 }
 0x1bd   : > { %v459_v37 = vpop.f32.mrf.mxu1 }
 0x1be   : > { %v460_v39 = vadd.f32 %v459_v37, %v378_v34  ;;  %v1150_v37 = vmov 1966171168  }
 0x1bf   : > { %v461_v40 = vpop.f32.mrf.mxu1  ;;  %v868_v38 = vunpack.c.l.s4 %v1150_v37 }
 0x1c0   : > { %v462_v42 = vadd.f32 %v461_v40, %v378_v34  ;;  %v785_v34 = vshrl.u32 %v784_v33, 7 }
 0x1c2   : > { %1054 = vtanh.f32 %v462_v42  ;;  %v786_v35 = vsub.s32 0, %v785_v34 }
 0x1c3   : > { %1056 = vtanh.f32 %v460_v39 }
 0x1c4   : > { %1058 = vtanh.f32 %v456_v41  ;;  %v787_v39 = vrot.slane %v782_v36, %v786_v35  ;;  %v869_v41 = vunpack.c.0.s8 %v868_v38 }
 0x1c5   : > { %1060 = vtanh.f32 %v454_v43 }
 0x1cf   : > { %v1055_v44 = vpop.eup %1054 }
 0x1d0   : > { %v1057_v45 = vpop.eup %1056  ;;  %518 = vmatprep.subr.mxu0 %v1055_v44 }
 0x1d1   : > { %v1059_v46 = vpop.eup %1058  ;;  %519 = vmatpush1.msra.mxu0 %v1057_v45  ;;  %v872_v45 = vsub.s32 %v869_v41, %v785_v34 }
 0x1d2   : > { %v1061_v48 = vpop.eup %1060  ;;  %520 = vmatprep.subr.mxu0 %v1059_v46 }
 0x1d3   : > { %521 = vmatpush1.msra.mxu0 %v1061_v48 }
 0x1d4   : > { %980 = vmatmul.mubr.msk.f32.vlgmr.msra.gmra.mxu0 %vm380_vm2, %v976_v47 }
 0x1d5   : > { %560 = vmatprep.mubr.f32.mxu0 %v1148_v1 }
 0x1d8   : > { %981 = vmatmul.mubr.msk.f32.gmra.mxu0 %vm380_vm2, %v977_v49 }
 0x1d9   : > { %760 = vmatprep.mubr.f32.mxu0 %v1148_v1 }
 0x294   : > { %v556_v50 = vpop.f32.mrf.mxu0 }
 0x295   : > { %v557_v59 = vadd.f32 %v556_v50, %v477_v54 }
 0x296   : > { %v558_v51 = vpop.f32.mrf.mxu0 }
 0x297   : > { %v559_v57 = vadd.f32 %v558_v51, %v477_v54 }
 0x298   : > { %v562_v52 = vpop.f32.mrf.mxu0 }
 0x299   : > { %v563_v55 = vadd.f32 %v562_v52, %v482_v53 }
 0x29a   : > { %v564_v56 = vpop.f32.mrf.mxu0 }
 0x29b   : > { %v565_v58 = vadd.f32 %v564_v56, %v482_v53 }
 0x29d   : > { %1062 = vtanh.f32 %v565_v58 }
 0x29e   : > { %1064 = vtanh.f32 %v563_v55 }
 0x29f   : > { %1066 = vtanh.f32 %v559_v57 }
 0x2a0   : > { %1068 = vtanh.f32 %v557_v59 }
 0x2aa   : > { %v1063_v60 = vpop.eup %1062 }
 0x2ab   : > { %v1065_v61 = vpop.eup %1064  ;;  %621 = vmatprep.subr.mxu1 %v1063_v60 }
 0x2ac   : > { %v1067_v62 = vpop.eup %1066  ;;  %622 = vmatpush1.msra.mxu1 %v1065_v61 }
 0x2ad   : > { %v1069_v0 = vpop.eup %1068  ;;  %623 = vmatprep.subr.mxu1 %v1067_v62 }
 0x2ae   : > { %624 = vmatpush1.msra.mxu1 %v1069_v0 }
 0x2af   : > { %986 = vmatmul.mubr.msk.f32.vlgmr.msra.gmra.mxu1 %vm380_vm2, %v982_v63 }
 0x2b0   : > { %663 = vmatprep.mubr.f32.mxu1 %v1148_v1 }
 0x2b3   : > { %987 = vmatmul.mubr.msk.f32.gmra.mxu1 %vm380_vm2, %v983_v2 }
 0x2b4   : > { %855 = vmatprep.mubr.f32.mxu1 %v1148_v1 }
 0x36f   : > { %v659_v3 = vpop.f32.mrf.mxu1 }
 0x370   : > { %v660_v12 = vadd.f32 %v659_v3, %v580_v7 }
 0x371   : > { %v661_v4 = vpop.f32.mrf.mxu1 }
 0x372   : > { %v662_v10 = vadd.f32 %v661_v4, %v580_v7 }
 0x373   : > { %v665_v5 = vpop.f32.mrf.mxu1 }
 0x374   : > { %v666_v8 = vadd.f32 %v665_v5, %v585_v6 }
 0x375   : > { %v667_v9 = vpop.f32.mrf.mxu1 }
 0x376   : > { %v668_v11 = vadd.f32 %v667_v9, %v585_v6 }
 0x378   : > { %1070 = vtanh.f32 %v668_v11 }
 0x379   : > { %1072 = vtanh.f32 %v666_v8 }
 0x37a   : > { %1074 = vtanh.f32 %v662_v10 }
 0x37b   : > { %1076 = vtanh.f32 %v660_v12 }
 0x385   : > { %v1071_v13 = vpop.eup %1070 }
 0x386   : > { %v1073_v14 = vpop.eup %1072  ;;  %724 = vmatprep.subr.mxu0 %v1071_v13 }
 0x387   : > { %v1075_v15 = vpop.eup %1074  ;;  %725 = vmatpush1.msra.mxu0 %v1073_v14 }
 0x388   : > { %v1077_v17 = vpop.eup %1076  ;;  %726 = vmatprep.subr.mxu0 %v1075_v15 }
 0x389   : > { %727 = vmatpush1.msra.mxu0 %v1077_v17 }
 0x38a   : > { %992 = vmatmul.mubr.msk.f32.vlgmr.msra.gmra.mxu0 %vm380_vm2, %v988_v16 }
 0x38b   : > { %766 = vmatprep.mubr.f32.mxu0 %v1148_v1 }
 0x38e   : > { %993 = vmatmul.mubr.msk.f32.gmra.mxu0 %vm380_vm2, %v989_v18 }
 0x44a   : > { %v762_v19 = vpop.f32.mrf.mxu0 }
 0x44b   : > { %v763_v28 = vadd.f32 %v762_v19, %v683_v23 }
 0x44c   : > { %v764_v20 = vpop.f32.mrf.mxu0 }
 0x44d   : > { %v765_v26 = vadd.f32 %v764_v20, %v683_v23 }
 0x44e   : > { %v768_v21 = vpop.f32.mrf.mxu0 }
 0x44f   : > { %v769_v24 = vadd.f32 %v768_v21, %v688_v22 }
 0x450   : > { %v770_v25 = vpop.f32.mrf.mxu0 }
 0x451   : > { %v771_v27 = vadd.f32 %v770_v25, %v688_v22 }
 0x453   : > { %1078 = vtanh.f32 %v771_v27 }
 0x454   : > { %1080 = vtanh.f32 %v769_v24 }
 0x455   : > { %1082 = vtanh.f32 %v765_v26 }
 0x456   : > { %1084 = vtanh.f32 %v763_v28 }
 0x460   : > { %v1079_v1 = vpop.eup %1078 }
 0x461   : > { %v1081_v29 = vpop.eup %1080  ;;  %819 = vmatprep.subr.mxu1 %v1079_v1 }
 0x462   : > { %v1083_v30 = vpop.eup %1082  ;;  %820 = vmatpush1.msra.mxu1 %v1081_v29 }
 0x463   : > { %v1085_v32 = vpop.eup %1084  ;;  %821 = vmatprep.subr.mxu1 %v1083_v30 }
 0x464   : > { %822 = vmatpush1.msra.mxu1 %v1085_v32 }
 0x465   : > { %994 = vmatmul.mubr.msk.f32.vlgmr.msra.gmra.mxu1 %vm380_vm2, %v777_v31 }
 0x525   : > { %v857_v40 = vpop.f32.mrf.mxu1 }
 0x526   : > { %v858_v42 = vadd.f32 %v857_v40, %v787_v39 }
 0x527   : > { %v859_v43 = vpop.f32.mrf.mxu1 }
 0x528   : > { %v860_v44 = vadd.f32 %v859_v43, %v787_v39  ;;  %v862_v46 = vmax.f32 %v858_v42, 0.0 }
 0x52a   : > { %v863_v47 = vmax.f32 %v860_v44, 0.0 }
 0x52c   : > { %v866_v48 = vcombine.low %v862_v46, %v863_v47 }
 0x52e   : > { %v873_v49 = vrot.slane %v866_v48, %v872_v45 }
 0x530   : > { %v880_v50 = vrot.slane %v873_v49, %v872_v45 }
 0x532   : > { %886 = vst.msk [vmem:[%s247_s12] sm:$0x3] %vm884_vm3, %v880_v50 }
 0x533   : > { %1099 = shalt.err (!%p1096_p3)
}
 0x534   : > { %s1100_s21 = scalar_lea.hbm %s900_s16, 32  ;;  %s1104_s29 = scalar_lea.hbm %s1365_s6, 64 }
 0x535   : > { %p1101_p4 = scmp.ne.s32.totalorder %s900_s16, %s1100_s21  ;;  %p1105_p9 = scmp.lt.s32.totalorder %s900_s16, %s1365_s6 }
 0x536   : > { %p1106_p10 = scmp.lt.s32.totalorder %s1104_s29, %s1100_s21 }
 0x537   : > { %p1102_p7 = pnand %p1101_p4, %p1228_p5 }
 0x538   : > { %p1107_p11 = por %p1106_p10, %p1105_p9 }
 0x539   : > { %p1103_p8 = pneg %p1102_p7 }
 0x53b   : > { %p1108_p12 = pnand %p1107_p11, %p1103_p8 }
 0x53d   : > { %1111 = shalt.err (!%p1108_p12)
}
 0x53e   : > { %1001 = dma.vmem_to_hbm [thread:$0]  (%p1228_p5), %s903_s13, 32, %s900_s16, %s888_s17  }
 0x53f PF: > { %p1007_p13 = scmp.ge.s32.totalorder %s1146_s26, 2  ;;  %s914_s11 = sand.u32 1, %s1134_s23  }
 0x540   : > { %s915_s12 = scalar_lea.sflag [#allocation4], %s914_s11 }
 0x541   : > { %p1004_p0 = pnand %p1007_p13, %p1232_p6 }
 0x543   : > { %p1005_p1 = pneg %p1004_p0 }
 0x545   : > { %1129 = dma.done.wait (%p1005_p1), %s915_s12, 32  }
 0x546   : > { %1131 = vsyncadd (%p1005_p1), %s915_s12, 4294967264  ;;  %p18_p2 = scmp.ge.s32.totalorder %s1215_s28, 4   ;;  %s1368_s23 = smov %s1138_s24 }
 0x547   : > { %s1369_s24 = smov %s1142_s25  ;;  %s1370_s25 = smov %s1226_s7 }
 0x548   : > { %s1371_s26 = smov %s1215_s28  ;;  %20 = sbr.rel (!%p18_p2) target bundleno = 6 (0x6), region = 86 }
 0x54d   :  { %920 = vsyncpa [#allocation4], 1 }
 0x54e   :  { %922 = vsyncpa [#allocation4 + $0x1], 1 }

</bundles_post_ra>
